<compile_context>
chip_gen: v7x
topology: tpu7x:2x2x1
jax: 0.10.0
libtpu: 0.0.40
codegen_flags: <defaults>
</compile_context>

<pallas_src>
import jax
import jax.numpy as jnp
from jax.experimental import pallas as pl
from jax.experimental.pallas import tpu as pltpu

BN_EPS = 1e-5


def _resblock_kernel(xu_ref, xm_ref, xd_ref, su_ref, sd_ref,
                     w1_ref, w2_ref, ws_ref,
                     s1_ref, b1_ref, s2_ref, b2_ref, ss_ref, bs_ref,
                     o_ref):
    f32 = jnp.float32

    # ---- conv1 (3x3, pad=1) : 3 banded matmuls over pre-shifted rows ----
    acc1 = jnp.dot(xu_ref[...], w1_ref[0], preferred_element_type=f32)
    acc1 = acc1 + jnp.dot(xm_ref[...], w1_ref[1], preferred_element_type=f32)
    acc1 = acc1 + jnp.dot(xd_ref[...], w1_ref[2], preferred_element_type=f32)
    # BN1 (folded, per-lane) + ReLU
    y1 = jnp.maximum(acc1 * s1_ref[...] + b1_ref[...], 0.0)        # (R, W*Cout) f32
    y1b = y1.astype(jnp.bfloat16)

    # in-kernel row shifts of y1 (zero across image boundaries) via 0/1 matrices
    y1u = jnp.dot(su_ref[...], y1b, preferred_element_type=f32).astype(jnp.bfloat16)
    y1d = jnp.dot(sd_ref[...], y1b, preferred_element_type=f32).astype(jnp.bfloat16)

    # ---- conv2 (3x3, pad=1) + BN2 ----
    acc2 = jnp.dot(y1u, w2_ref[0], preferred_element_type=f32)
    acc2 = acc2 + jnp.dot(y1b, w2_ref[1], preferred_element_type=f32)
    acc2 = acc2 + jnp.dot(y1d, w2_ref[2], preferred_element_type=f32)
    y2 = acc2 * s2_ref[...] + b2_ref[...]

    # ---- shortcut: 1x1 conv + BN on the original input ----
    sc = jnp.dot(xm_ref[...], ws_ref[...], preferred_element_type=f32)
    sc = sc * ss_ref[...] + bs_ref[...]

    # ---- residual add + final ReLU, lane-dense store ----
    o_ref[...] = jnp.maximum(y2 + sc, 0.0).astype(o_ref.dtype)


def residual_block_pallas(x_nchw, params):
    # NCHW -> NHWC
    x = jnp.transpose(x_nchw, (0, 2, 3, 1)).astype(jnp.float32)
    N, H, W, Cin = x.shape
    Cout = params["w1"].shape[0]
    R = N * H

    # OIHW -> (kh, kw, Cin, Cout)
    w1hw = jnp.transpose(params["w1"], (2, 3, 1, 0)).astype(jnp.float32)
    w2hw = jnp.transpose(params["w2"], (2, 3, 1, 0)).astype(jnp.float32)
    wshw = jnp.transpose(params["ws"], (2, 3, 1, 0))[0, 0].astype(jnp.float32)  # (Cin, Cout)

    # banded "width-conv as matmul" weights: one (W*cin, W*cout) matrix per kh.
    #   big[kh][w_in*cin + ci, w_out*cout + co] = whw[kh, kw, ci, co],  kw = w_in - w_out + 1
    def banded(whw, cin, cout):
        mats = []
        for kh in range(3):
            m = jnp.zeros((W * cin, W * cout), jnp.float32)
            for kw in range(3):
                m = m + jnp.kron(jnp.eye(W, k=1 - kw, dtype=jnp.float32), whw[kh, kw])
            mats.append(m)
        return jnp.stack(mats, 0)

    w1big = banded(w1hw, Cin, Cout).astype(jnp.bfloat16)              # (3, W*Cin,  W*Cout)
    w2big = banded(w2hw, Cout, Cout).astype(jnp.bfloat16)             # (3, W*Cout, W*Cout)
    wsbig = jnp.kron(jnp.eye(W, dtype=jnp.float32), wshw).astype(jnp.bfloat16)  # (W*Cin, W*Cout)

    # folded BN, tiled per output lane (lane = w*Cout + c)
    def fold_tile(bnp):
        gamma, beta, mean, var = bnp
        s = gamma / jnp.sqrt(var + BN_EPS)
        b = beta - mean * s
        return (jnp.tile(s, W).reshape(1, W * Cout).astype(jnp.float32),
                jnp.tile(b, W).reshape(1, W * Cout).astype(jnp.float32))

    s1, b1 = fold_tile(params["bn1"])
    s2, b2 = fold_tile(params["bn2"])
    ss, bs = fold_tile(params["bns"])

    # lane-dense rows: (N*H, W*Cin)
    xm_f = x.reshape(R, W * Cin)

    # per-image row-shift matrices (zero across image boundaries)
    su_f = jnp.kron(jnp.eye(N, dtype=jnp.float32), jnp.eye(H, k=-1, dtype=jnp.float32))  # row above
    sd_f = jnp.kron(jnp.eye(N, dtype=jnp.float32), jnp.eye(H, k=1, dtype=jnp.float32))   # row below

    xu = (su_f @ xm_f).astype(jnp.bfloat16)
    xd = (sd_f @ xm_f).astype(jnp.bfloat16)
    xm = xm_f.astype(jnp.bfloat16)
    su = su_f.astype(jnp.bfloat16)
    sd = sd_f.astype(jnp.bfloat16)

    vec = pl.BlockSpec((1, W * Cout), lambda i: (0, 0))
    full2 = lambda a, b: pl.BlockSpec((a, b), lambda i: (0, 0))

    out_flat = pl.pallas_call(
        _resblock_kernel,
        out_shape=jax.ShapeDtypeStruct((R, W * Cout), jnp.float32),
        grid_spec=pltpu.PrefetchScalarGridSpec(
            num_scalar_prefetch=0,
            grid=(1,),
            in_specs=[
                full2(R, W * Cin),                                   # xu
                full2(R, W * Cin),                                   # xm
                full2(R, W * Cin),                                   # xd
                full2(R, R),                                         # su
                full2(R, R),                                         # sd
                pl.BlockSpec((3, W * Cin, W * Cout), lambda i: (0, 0, 0)),   # w1big
                pl.BlockSpec((3, W * Cout, W * Cout), lambda i: (0, 0, 0)),  # w2big
                full2(W * Cin, W * Cout),                            # wsbig
                vec, vec,                                            # s1, b1
                vec, vec,                                            # s2, b2
                vec, vec,                                            # ss, bs
            ],
            out_specs=pl.BlockSpec((R, W * Cout), lambda i: (0, 0)),
        ),
        compiler_params=pltpu.CompilerParams(
            dimension_semantics=("arbitrary",)),
    )(xu, xm, xd, su, sd, w1big, w2big, wsbig, s1, b1, s2, b2, ss, bs)

    # (N*H, W*Cout) -> NHWC -> NCHW
    out_nhwc = out_flat.reshape(N, H, W, Cout)
    return jnp.transpose(out_nhwc, (0, 3, 1, 2))


def residual_block_ref(x, params):
    """Plain-JAX reference (NCHW, same math as the PyTorch module in eval mode)."""
    def conv(x, w, stride, pad):
        return jax.lax.conv_general_dilated(
            x, w, (stride, stride), [(pad, pad), (pad, pad)],
            dimension_numbers=("NCHW", "OIHW", "NCHW"),
            precision=jax.lax.Precision.HIGHEST)

    def bn(x, bnp):
        gamma, beta, mean, var = bnp
        s = gamma / jnp.sqrt(var + BN_EPS)
        return x * s[None, :, None, None] + (beta - mean * s)[None, :, None, None]

    y = jax.nn.relu(bn(conv(x, params["w1"], 1, 1), params["bn1"]))
    y = bn(conv(y, params["w2"], 1, 1), params["bn2"])
    sc = bn(conv(x, params["ws"], 1, 0), params["bns"])
    return jax.nn.relu(y + sc)


def init_params(key, cin, cout):
    ks = jax.random.split(key, 6)

    def bn_params(k):
        k1, k2, k3, k4 = jax.random.split(k, 4)
        gamma = 1.0 + 0.1 * jax.random.normal(k1, (cout,), jnp.float32)
        beta = 0.1 * jax.random.normal(k2, (cout,), jnp.float32)
        mean = 0.1 * jax.random.normal(k3, (cout,), jnp.float32)
        var = jnp.abs(jax.random.normal(k4, (cout,), jnp.float32)) + 0.5
        return (gamma, beta, mean, var)

    return {
        "w1": 0.2 * jax.random.normal(ks[0], (cout, cin, 3, 3), jnp.float32),
        "bn1": bn_params(ks[1]),
        "w2": 0.2 * jax.random.normal(ks[2], (cout, cout, 3, 3), jnp.float32),
        "bn2": bn_params(ks[3]),
        "ws": 0.2 * jax.random.normal(ks[4], (cout, cin, 1, 1), jnp.float32),
        "bns": bn_params(ks[5]),
    }


if __name__ == "__main__":
    key = jax.random.PRNGKey(0)
    kx, kp = jax.random.split(key)

    N, Cin, Cout, H, W = 2, 4, 8, 16, 16
    x = jax.random.normal(kx, (N, Cin, H, W), jnp.float32)  # PyTorch-style NCHW
    params = init_params(kp, Cin, Cout)

    out = jax.jit(residual_block_pallas)(x, params)
    out = jax.block_until_ready(out)

    ref = residual_block_ref(x, params)
    assert out.shape == ref.shape == (N, Cout, H, W)
    max_err = float(jnp.max(jnp.abs(out - ref)))
    if not jnp.allclose(out, ref, atol=5e-2, rtol=5e-2):
        raise AssertionError(f"Pallas/reference mismatch, max abs err = {max_err}")

    print("KERNEL_OK")
</pallas_src>

<mosaic_0001>
module attributes {stable_mosaic.version = 11 : i64} {
  func.func @_resblock_kernel(%arg0: i32, %arg1: memref<32x64xbf16, #tpu.memory_space<vmem>>, %arg2: memref<32x64xbf16, #tpu.memory_space<vmem>>, %arg3: memref<32x64xbf16, #tpu.memory_space<vmem>>, %arg4: memref<32x32xbf16, #tpu.memory_space<vmem>>, %arg5: memref<32x32xbf16, #tpu.memory_space<vmem>>, %arg6: memref<3x64x128xbf16, #tpu.memory_space<vmem>>, %arg7: memref<3x128x128xbf16, #tpu.memory_space<vmem>>, %arg8: memref<64x128xbf16, #tpu.memory_space<vmem>>, %arg9: memref<1x128xf32, #tpu.memory_space<vmem>>, %arg10: memref<1x128xf32, #tpu.memory_space<vmem>>, %arg11: memref<1x128xf32, #tpu.memory_space<vmem>>, %arg12: memref<1x128xf32, #tpu.memory_space<vmem>>, %arg13: memref<1x128xf32, #tpu.memory_space<vmem>>, %arg14: memref<1x128xf32, #tpu.memory_space<vmem>>, %arg15: memref<32x128xf32, #tpu.memory_space<vmem>>) attributes {dimension_semantics = [#tpu.dimension_semantics<arbitrary>], iteration_bounds = array<i64: 1>, scalar_prefetch = 0 : i64, scratch_operands = 0 : i64, tpu.core_type = #tpu.core_type<tc>, window_params = [{pipeline_mode = #tpu.pipeline_mode<synchronous>, transform_indices = @transform_0, window_bounds = array<i64: 32, 64>}, {pipeline_mode = #tpu.pipeline_mode<synchronous>, transform_indices = @transform_1, window_bounds = array<i64: 32, 64>}, {pipeline_mode = #tpu.pipeline_mode<synchronous>, transform_indices = @transform_2, window_bounds = array<i64: 32, 64>}, {pipeline_mode = #tpu.pipeline_mode<synchronous>, transform_indices = @transform_3, window_bounds = array<i64: 32, 32>}, {pipeline_mode = #tpu.pipeline_mode<synchronous>, transform_indices = @transform_4, window_bounds = array<i64: 32, 32>}, {pipeline_mode = #tpu.pipeline_mode<synchronous>, transform_indices = @transform_5, window_bounds = array<i64: 3, 64, 128>}, {pipeline_mode = #tpu.pipeline_mode<synchronous>, transform_indices = @transform_6, window_bounds = array<i64: 3, 128, 128>}, {pipeline_mode = #tpu.pipeline_mode<synchronous>, transform_indices = @transform_7, window_bounds = array<i64: 64, 128>}, {pipeline_mode = #tpu.pipeline_mode<synchronous>, transform_indices = @transform_8, window_bounds = array<i64: 1, 128>}, {pipeline_mode = #tpu.pipeline_mode<synchronous>, transform_indices = @transform_9, window_bounds = array<i64: 1, 128>}, {pipeline_mode = #tpu.pipeline_mode<synchronous>, transform_indices = @transform_10, window_bounds = array<i64: 1, 128>}, {pipeline_mode = #tpu.pipeline_mode<synchronous>, transform_indices = @transform_11, window_bounds = array<i64: 1, 128>}, {pipeline_mode = #tpu.pipeline_mode<synchronous>, transform_indices = @transform_12, window_bounds = array<i64: 1, 128>}, {pipeline_mode = #tpu.pipeline_mode<synchronous>, transform_indices = @transform_13, window_bounds = array<i64: 1, 128>}, {pipeline_mode = #tpu.pipeline_mode<synchronous>, transform_indices = @transform_14, window_bounds = array<i64: 32, 128>}]} {
    %c0 = arith.constant 0 : index
    %c0_0 = arith.constant 0 : index
    %0 = vector.load %arg1[%c0, %c0_0] : memref<32x64xbf16, #tpu.memory_space<vmem>>, vector<32x64xbf16>
    %c0_1 = arith.constant 0 : index
    %c0_2 = arith.constant 0 : index
    %c0_3 = arith.constant 0 : index
    %1 = vector.load %arg6[%c0_1, %c0_2, %c0_3] : memref<3x64x128xbf16, #tpu.memory_space<vmem>>, vector<1x64x128xbf16>
    %2 = vector.shape_cast %1 : vector<1x64x128xbf16> to vector<64x128xbf16>
    %cst = arith.constant dense<0.000000e+00> : vector<32x128xf32>
    %3 = tpu.matmul %0, %2, %cst {dimension_numbers = #tpu.dot_dimension_numbers<[1], [0], [0], [1], [0, 0, 1, 1], [], []>} : vector<32x64xbf16>, vector<64x128xbf16>, vector<32x128xf32> -> vector<32x128xf32>
    %c0_4 = arith.constant 0 : index
    %c0_5 = arith.constant 0 : index
    %4 = vector.load %arg2[%c0_4, %c0_5] : memref<32x64xbf16, #tpu.memory_space<vmem>>, vector<32x64xbf16>
    %c1 = arith.constant 1 : index
    %c0_6 = arith.constant 0 : index
    %c0_7 = arith.constant 0 : index
    %5 = vector.load %arg6[%c1, %c0_6, %c0_7] : memref<3x64x128xbf16, #tpu.memory_space<vmem>>, vector<1x64x128xbf16>
    %6 = vector.shape_cast %5 : vector<1x64x128xbf16> to vector<64x128xbf16>
    %cst_8 = arith.constant dense<0.000000e+00> : vector<32x128xf32>
    %7 = tpu.matmul %4, %6, %cst_8 {dimension_numbers = #tpu.dot_dimension_numbers<[1], [0], [0], [1], [0, 0, 1, 1], [], []>} : vector<32x64xbf16>, vector<64x128xbf16>, vector<32x128xf32> -> vector<32x128xf32>
    %8 = arith.addf %3, %7 : vector<32x128xf32>
    %c0_9 = arith.constant 0 : index
    %c0_10 = arith.constant 0 : index
    %9 = vector.load %arg3[%c0_9, %c0_10] : memref<32x64xbf16, #tpu.memory_space<vmem>>, vector<32x64xbf16>
    %c2 = arith.constant 2 : index
    %c0_11 = arith.constant 0 : index
    %c0_12 = arith.constant 0 : index
    %10 = vector.load %arg6[%c2, %c0_11, %c0_12] : memref<3x64x128xbf16, #tpu.memory_space<vmem>>, vector<1x64x128xbf16>
    %11 = vector.shape_cast %10 : vector<1x64x128xbf16> to vector<64x128xbf16>
    %cst_13 = arith.constant dense<0.000000e+00> : vector<32x128xf32>
    %12 = tpu.matmul %9, %11, %cst_13 {dimension_numbers = #tpu.dot_dimension_numbers<[1], [0], [0], [1], [0, 0, 1, 1], [], []>} : vector<32x64xbf16>, vector<64x128xbf16>, vector<32x128xf32> -> vector<32x128xf32>
    %13 = arith.addf %8, %12 : vector<32x128xf32>
    %c0_14 = arith.constant 0 : index
    %c0_15 = arith.constant 0 : index
    %14 = vector.load %arg9[%c0_14, %c0_15] : memref<1x128xf32, #tpu.memory_space<vmem>>, vector<1x128xf32>
    %15 = vector.broadcast %14 : vector<1x128xf32> to vector<32x128xf32>
    %16 = arith.mulf %13, %15 : vector<32x128xf32>
    %c0_16 = arith.constant 0 : index
    %c0_17 = arith.constant 0 : index
    %17 = vector.load %arg10[%c0_16, %c0_17] : memref<1x128xf32, #tpu.memory_space<vmem>>, vector<1x128xf32>
    %18 = vector.broadcast %17 : vector<1x128xf32> to vector<32x128xf32>
    %19 = arith.addf %16, %18 : vector<32x128xf32>
    %cst_18 = arith.constant 0.000000e+00 : f32
    %20 = vector.broadcast %cst_18 : f32 to vector<32x128xf32>
    %21 = arith.maximumf %19, %20 : vector<32x128xf32>
    %22 = arith.truncf %21 : vector<32x128xf32> to vector<32x128xbf16>
    %c0_19 = arith.constant 0 : index
    %c0_20 = arith.constant 0 : index
    %23 = vector.load %arg4[%c0_19, %c0_20] : memref<32x32xbf16, #tpu.memory_space<vmem>>, vector<32x32xbf16>
    %cst_21 = arith.constant dense<0.000000e+00> : vector<32x128xf32>
    %24 = tpu.matmul %23, %22, %cst_21 {dimension_numbers = #tpu.dot_dimension_numbers<[1], [0], [0], [1], [0, 0, 1, 1], [], []>} : vector<32x32xbf16>, vector<32x128xbf16>, vector<32x128xf32> -> vector<32x128xf32>
    %25 = arith.truncf %24 : vector<32x128xf32> to vector<32x128xbf16>
    %c0_22 = arith.constant 0 : index
    %c0_23 = arith.constant 0 : index
    %26 = vector.load %arg5[%c0_22, %c0_23] : memref<32x32xbf16, #tpu.memory_space<vmem>>, vector<32x32xbf16>
    %cst_24 = arith.constant dense<0.000000e+00> : vector<32x128xf32>
    %27 = tpu.matmul %26, %22, %cst_24 {dimension_numbers = #tpu.dot_dimension_numbers<[1], [0], [0], [1], [0, 0, 1, 1], [], []>} : vector<32x32xbf16>, vector<32x128xbf16>, vector<32x128xf32> -> vector<32x128xf32>
    %28 = arith.truncf %27 : vector<32x128xf32> to vector<32x128xbf16>
    %c0_25 = arith.constant 0 : index
    %c0_26 = arith.constant 0 : index
    %c0_27 = arith.constant 0 : index
    %29 = vector.load %arg7[%c0_25, %c0_26, %c0_27] : memref<3x128x128xbf16, #tpu.memory_space<vmem>>, vector<1x128x128xbf16>
    %30 = vector.shape_cast %29 : vector<1x128x128xbf16> to vector<128x128xbf16>
    %cst_28 = arith.constant dense<0.000000e+00> : vector<32x128xf32>
    %31 = tpu.matmul %25, %30, %cst_28 {dimension_numbers = #tpu.dot_dimension_numbers<[1], [0], [0], [1], [0, 0, 1, 1], [], []>} : vector<32x128xbf16>, vector<128x128xbf16>, vector<32x128xf32> -> vector<32x128xf32>
    %c1_29 = arith.constant 1 : index
    %c0_30 = arith.constant 0 : index
    %c0_31 = arith.constant 0 : index
    %32 = vector.load %arg7[%c1_29, %c0_30, %c0_31] : memref<3x128x128xbf16, #tpu.memory_space<vmem>>, vector<1x128x128xbf16>
    %33 = vector.shape_cast %32 : vector<1x128x128xbf16> to vector<128x128xbf16>
    %cst_32 = arith.constant dense<0.000000e+00> : vector<32x128xf32>
    %34 = tpu.matmul %22, %33, %cst_32 {dimension_numbers = #tpu.dot_dimension_numbers<[1], [0], [0], [1], [0, 0, 1, 1], [], []>} : vector<32x128xbf16>, vector<128x128xbf16>, vector<32x128xf32> -> vector<32x128xf32>
    %35 = arith.addf %31, %34 : vector<32x128xf32>
    %c2_33 = arith.constant 2 : index
    %c0_34 = arith.constant 0 : index
    %c0_35 = arith.constant 0 : index
    %36 = vector.load %arg7[%c2_33, %c0_34, %c0_35] : memref<3x128x128xbf16, #tpu.memory_space<vmem>>, vector<1x128x128xbf16>
    %37 = vector.shape_cast %36 : vector<1x128x128xbf16> to vector<128x128xbf16>
    %cst_36 = arith.constant dense<0.000000e+00> : vector<32x128xf32>
    %38 = tpu.matmul %28, %37, %cst_36 {dimension_numbers = #tpu.dot_dimension_numbers<[1], [0], [0], [1], [0, 0, 1, 1], [], []>} : vector<32x128xbf16>, vector<128x128xbf16>, vector<32x128xf32> -> vector<32x128xf32>
    %39 = arith.addf %35, %38 : vector<32x128xf32>
    %c0_37 = arith.constant 0 : index
    %c0_38 = arith.constant 0 : index
    %40 = vector.load %arg11[%c0_37, %c0_38] : memref<1x128xf32, #tpu.memory_space<vmem>>, vector<1x128xf32>
    %41 = vector.broadcast %40 : vector<1x128xf32> to vector<32x128xf32>
    %42 = arith.mulf %39, %41 : vector<32x128xf32>
    %c0_39 = arith.constant 0 : index
    %c0_40 = arith.constant 0 : index
    %43 = vector.load %arg12[%c0_39, %c0_40] : memref<1x128xf32, #tpu.memory_space<vmem>>, vector<1x128xf32>
    %44 = vector.broadcast %43 : vector<1x128xf32> to vector<32x128xf32>
    %45 = arith.addf %42, %44 : vector<32x128xf32>
    %c0_41 = arith.constant 0 : index
    %c0_42 = arith.constant 0 : index
    %46 = vector.load %arg2[%c0_41, %c0_42] : memref<32x64xbf16, #tpu.memory_space<vmem>>, vector<32x64xbf16>
    %c0_43 = arith.constant 0 : index
    %c0_44 = arith.constant 0 : index
    %47 = vector.load %arg8[%c0_43, %c0_44] : memref<64x128xbf16, #tpu.memory_space<vmem>>, vector<64x128xbf16>
    %cst_45 = arith.constant dense<0.000000e+00> : vector<32x128xf32>
    %48 = tpu.matmul %46, %47, %cst_45 {dimension_numbers = #tpu.dot_dimension_numbers<[1], [0], [0], [1], [0, 0, 1, 1], [], []>} : vector<32x64xbf16>, vector<64x128xbf16>, vector<32x128xf32> -> vector<32x128xf32>
    %c0_46 = arith.constant 0 : index
    %c0_47 = arith.constant 0 : index
    %49 = vector.load %arg13[%c0_46, %c0_47] : memref<1x128xf32, #tpu.memory_space<vmem>>, vector<1x128xf32>
    %50 = vector.broadcast %49 : vector<1x128xf32> to vector<32x128xf32>
    %51 = arith.mulf %48, %50 : vector<32x128xf32>
    %c0_48 = arith.constant 0 : index
    %c0_49 = arith.constant 0 : index
    %52 = vector.load %arg14[%c0_48, %c0_49] : memref<1x128xf32, #tpu.memory_space<vmem>>, vector<1x128xf32>
    %53 = vector.broadcast %52 : vector<1x128xf32> to vector<32x128xf32>
    %54 = arith.addf %51, %53 : vector<32x128xf32>
    %55 = arith.addf %45, %54 : vector<32x128xf32>
    %cst_50 = arith.constant 0.000000e+00 : f32
    %56 = vector.broadcast %cst_50 : f32 to vector<32x128xf32>
    %57 = arith.maximumf %55, %56 : vector<32x128xf32>
    %c0_51 = arith.constant 0 : index
    %c0_52 = arith.constant 0 : index
    %58 = vector.load %arg15[%c0_51, %c0_52] : memref<32x128xf32, #tpu.memory_space<vmem>>, vector<32x128xf32>
    tpu.vector_store %arg15[%c0_51, %c0_52], %57 {strides = array<i32>} : memref<32x128xf32, #tpu.memory_space<vmem>>, vector<32x128xf32>,
    return
  }
  func.func @transform_0(%arg0: i32) -> (i32, i32) {
    %c0_i32 = arith.constant 0 : i32
    %c0_i32_0 = arith.constant 0 : i32
    %c0_i32_1 = arith.constant 0 : i32
    return %c0_i32, %c0_i32_0 : i32, i32
  }
  func.func @transform_1(%arg0: i32) -> (i32, i32) {
    %c0_i32 = arith.constant 0 : i32
    %c0_i32_0 = arith.constant 0 : i32
    %c0_i32_1 = arith.constant 0 : i32
    return %c0_i32, %c0_i32_0 : i32, i32
  }
  func.func @transform_2(%arg0: i32) -> (i32, i32) {
    %c0_i32 = arith.constant 0 : i32
    %c0_i32_0 = arith.constant 0 : i32
    %c0_i32_1 = arith.constant 0 : i32
    return %c0_i32, %c0_i32_0 : i32, i32
  }
  func.func @transform_3(%arg0: i32) -> (i32, i32) {
    %c0_i32 = arith.constant 0 : i32
    %c0_i32_0 = arith.constant 0 : i32
    %c0_i32_1 = arith.constant 0 : i32
    return %c0_i32, %c0_i32_0 : i32, i32
  }
  func.func @transform_4(%arg0: i32) -> (i32, i32) {
    %c0_i32 = arith.constant 0 : i32
    %c0_i32_0 = arith.constant 0 : i32
    %c0_i32_1 = arith.constant 0 : i32
    return %c0_i32, %c0_i32_0 : i32, i32
  }
  func.func @transform_5(%arg0: i32) -> (i32, i32, i32) {
    %c0_i32 = arith.constant 0 : i32
    %c0_i32_0 = arith.constant 0 : i32
    %c0_i32_1 = arith.constant 0 : i32
    %c0_i32_2 = arith.constant 0 : i32
    return %c0_i32, %c0_i32_0, %c0_i32_1 : i32, i32, i32
  }
  func.func @transform_6(%arg0: i32) -> (i32, i32, i32) {
    %c0_i32 = arith.constant 0 : i32
    %c0_i32_0 = arith.constant 0 : i32
    %c0_i32_1 = arith.constant 0 : i32
    %c0_i32_2 = arith.constant 0 : i32
    return %c0_i32, %c0_i32_0, %c0_i32_1 : i32, i32, i32
  }
  func.func @transform_7(%arg0: i32) -> (i32, i32) {
    %c0_i32 = arith.constant 0 : i32
    %c0_i32_0 = arith.constant 0 : i32
    %c0_i32_1 = arith.constant 0 : i32
    return %c0_i32, %c0_i32_0 : i32, i32
  }
  func.func @transform_8(%arg0: i32) -> (i32, i32) {
    %c0_i32 = arith.constant 0 : i32
    %c0_i32_0 = arith.constant 0 : i32
    %c0_i32_1 = arith.constant 0 : i32
    return %c0_i32, %c0_i32_0 : i32, i32
  }
  func.func @transform_9(%arg0: i32) -> (i32, i32) {
    %c0_i32 = arith.constant 0 : i32
    %c0_i32_0 = arith.constant 0 : i32
    %c0_i32_1 = arith.constant 0 : i32
    return %c0_i32, %c0_i32_0 : i32, i32
  }
  func.func @transform_10(%arg0: i32) -> (i32, i32) {
    %c0_i32 = arith.constant 0 : i32
    %c0_i32_0 = arith.constant 0 : i32
    %c0_i32_1 = arith.constant 0 : i32
    return %c0_i32, %c0_i32_0 : i32, i32
  }
  func.func @transform_11(%arg0: i32) -> (i32, i32) {
    %c0_i32 = arith.constant 0 : i32
    %c0_i32_0 = arith.constant 0 : i32
    %c0_i32_1 = arith.constant 0 : i32
    return %c0_i32, %c0_i32_0 : i32, i32
  }
  func.func @transform_12(%arg0: i32) -> (i32, i32) {
    %c0_i32 = arith.constant 0 : i32
    %c0_i32_0 = arith.constant 0 : i32
    %c0_i32_1 = arith.constant 0 : i32
    return %c0_i32, %c0_i32_0 : i32, i32
  }
  func.func @transform_13(%arg0: i32) -> (i32, i32) {
    %c0_i32 = arith.constant 0 : i32
    %c0_i32_0 = arith.constant 0 : i32
    %c0_i32_1 = arith.constant 0 : i32
    return %c0_i32, %c0_i32_0 : i32, i32
  }
  func.func @transform_14(%arg0: i32) -> (i32, i32) {
    %c0_i32 = arith.constant 0 : i32
    %c0_i32_0 = arith.constant 0 : i32
    %c0_i32_1 = arith.constant 0 : i32
    return %c0_i32, %c0_i32_0 : i32, i32
  }
}

</mosaic_0001>

<bundles_post_ra>
// kernel: tile.33
= control target key start
LH: loop header
LB: loop body
LE: loop exit
PB: predicated region body
PF: predicated region fallthrough
CT: control target
= control target key end

     0   :  { %s28_s0 = inlined_call_operand.vmem [shape: f32[8], index: 0, kind: input, shape index: {}]   ;;  %s29_s1 = inlined_call_operand.vmem [shape: f32[16,8], index: 1, kind: output, shape index: {}]  }
   0x1   :  { %v4_v0 = vld [vmem:[%s28_s0] ss:$0 sm:$0xff] }
   0x2   :  { %5 = vst [vmem:[%s29_s1] sm:$0xff] %v4_v0  ;;  %8 = vst [vmem:[%s29_s1 + $0x8] sm:$0xff] %v4_v0 }

// kernel: tile.34
= control target key start
LH: loop header
LB: loop body
LE: loop exit
PB: predicated region body
PF: predicated region fallthrough
CT: control target
= control target key end

     0   :  { %s131_s10 = smov 120   ;;  %s132_s11 = smov 104   ;;  %vm3_vm0 = vcmask 64512   ;;  %vm9_vm1 = vcmask 1048512   ;;  %vm15_vm2 = vcmask 982912   ;;  %vm21_vm3 = vcmask 917312   ;;  %s207_s0 = inlined_call_operand.vmem [shape: f32[16,8], index: 0, kind: input, shape index: {}]   ;;  %s208_s1 = inlined_call_operand.vmem [shape: f32[1,128], index: 1, kind: output, shape index: {}]  }
   0x1   :  { %v101_v0 = vld [vmem:[%s207_s0 + $0xf] sm:$0x1]   ;;  %v103_v1 = vld [vmem:[%s207_s0 + $0xd] sm:$0x1]   ;;  %v102_v2 = vld [vmem:[%s207_s0 + $0xe] sm:$0x1]  }
   0x2   :  { %7 = vrot.lane.b32.xlu0 %v101_v0, %s131_s10  ;;  %19 = vrot.lane.b32.xlu1 %v103_v1, %s132_s11  ;;  %v104_v3 = vld [vmem:[%s207_s0 + $0xc] sm:$0x1]   ;;  %s133_s16 = smov 112   ;;  %s134_s17 = smov 96   ;;  %v105_v4 = vld [vmem:[%s207_s0 + $0xb] sm:$0x1]  }
   0x3   :  { %v106_v5 = vld [vmem:[%s207_s0 + $0xa] sm:$0x1]   ;;  %v2_v6 = vld [vmem:[%s207_s0] sm:$0x1]   ;;  %s135_s24 = smov 88   ;;  %s136_s25 = smov 80  }
   0x4   :  { %4 = vst.msk [vmem:[#allocation0] sm:$0x1] %vm3_vm0, %v2_v6   ;;  %v107_v7 = vld [vmem:[%s207_s0 + $0x9] sm:$0x1]   ;;  %v108_v8 = vld [vmem:[%s207_s0 + $0x8] sm:$0x1]  }
   0x5   :  { %s137_s30 = smov 72   ;;  %s138_s2 = smov 64   ;;  %v109_v9 = vld [vmem:[%s207_s0 + $0x7] sm:$0x1]   ;;  %v110_v10 = vld [vmem:[%s207_s0 + $0x6] sm:$0x1]  }
   0x6   :  { %13 = vrot.lane.b32.xlu0 %v102_v2, %s133_s16  ;;  %25 = vrot.lane.b32.xlu1 %v104_v3, %s134_s17  ;;  %s139_s7 = smov 56   ;;  %s140_s8 = smov 48   ;;  %v111_v11 = vld [vmem:[%s207_s0 + $0x5] sm:$0x1]   ;;  %v112_v12 = vld [vmem:[%s207_s0 + $0x4] sm:$0x1]  }
   0x7   :  { %s141_s13 = smov 40   ;;  %s142_s14 = smov 32   ;;  %v113_v13 = vld [vmem:[%s207_s0 + $0x3] sm:$0x1]   ;;  %v114_v14 = vld [vmem:[%s207_s0 + $0x2] sm:$0x1]  }
   0x8   :  { %s143_s19 = smov 24   ;;  %s144_s20 = smov 16   ;;  %v115_v15 = vld [vmem:[%s207_s0 + $0x1] sm:$0x1]   ;;  %vm27_vm4 = vcmask 851712   ;;  %vm33_vm5 = vcmask 786112  }
   0x9   :  { %s145_s0 = smov 8   ;;  %vm39_vm6 = vcmask 720512   ;;  %vm45_vm7 = vcmask 654912   ;;  %vm51_vm8 = vcmask 589312   ;;  %vm57_vm9 = vcmask 523712  }
   0xa   :  { %31 = vrot.lane.b32.xlu0 %v105_v4, %s135_s24  ;;  %37 = vrot.lane.b32.xlu1 %v106_v5, %s136_s25  ;;  %vm63_vm10 = vcmask 458112   ;;  %vm69_vm11 = vcmask 392512   ;;  %vm75_vm12 = vcmask 326912   ;;  %vm81_vm13 = vcmask 261312  }
   0xb   :  { %vm87_vm14 = vcmask 195712   ;;  %vm93_vm15 = vcmask 130112  }
   0xe   :  { %43 = vrot.lane.b32.xlu0 %v107_v7, %s137_s30  ;;  %49 = vrot.lane.b32.xlu1 %v108_v8, %s138_s2 }
  0x12   :  { %55 = vrot.lane.b32.xlu0 %v109_v9, %s139_s7  ;;  %61 = vrot.lane.b32.xlu1 %v110_v10, %s140_s8 }
  0x16   :  { %67 = vrot.lane.b32.xlu0 %v111_v11, %s141_s13  ;;  %73 = vrot.lane.b32.xlu1 %v112_v12, %s142_s14 }
  0x1a   :  { %79 = vrot.lane.b32.xlu0 %v113_v13, %s143_s19  ;;  %85 = vrot.lane.b32.xlu1 %v114_v14, %s144_s20 }
  0x1e   :  { %91 = vrot.lane.b32.xlu0 %v115_v15, %s145_s0 }
  0x74   :  { %v8_v16 = vpop.permute.xlu0 %7   ;;  %v20_v17 = vpop.permute.xlu1 %19  }
  0x75   :  { %10 = vst.msk [vmem:[#allocation0] sm:$0x1] %vm9_vm1, %v8_v16  }
  0x78   :  { %v14_v18 = vpop.permute.xlu0 %13   ;;  %v26_v19 = vpop.permute.xlu1 %25  }
  0x79   :  { %16 = vst.msk [vmem:[#allocation0] sm:$0x1] %vm15_vm2, %v14_v18  }
  0x7a   :  { %22 = vst.msk [vmem:[#allocation0] sm:$0x1] %vm21_vm3, %v20_v17  }
  0x7b   :  { %28 = vst.msk [vmem:[#allocation0] sm:$0x1] %vm27_vm4, %v26_v19  }
  0x7c   :  { %v32_v20 = vpop.permute.xlu0 %31   ;;  %v38_v21 = vpop.permute.xlu1 %37  }
  0x7d   :  { %34 = vst.msk [vmem:[#allocation0] sm:$0x1] %vm33_vm5, %v32_v20  }
  0x7e   :  { %40 = vst.msk [vmem:[#allocation0] sm:$0x1] %vm39_vm6, %v38_v21  }
  0x80   :  { %v44_v22 = vpop.permute.xlu0 %43   ;;  %v50_v23 = vpop.permute.xlu1 %49  }
  0x81   :  { %46 = vst.msk [vmem:[#allocation0] sm:$0x1] %vm45_vm7, %v44_v22  }
  0x82   :  { %52 = vst.msk [vmem:[#allocation0] sm:$0x1] %vm51_vm8, %v50_v23  }
  0x84   :  { %v56_v24 = vpop.permute.xlu0 %55   ;;  %v62_v25 = vpop.permute.xlu1 %61  }
  0x85   :  { %58 = vst.msk [vmem:[#allocation0] sm:$0x1] %vm57_vm9, %v56_v24  }
  0x86   :  { %64 = vst.msk [vmem:[#allocation0] sm:$0x1] %vm63_vm10, %v62_v25  }
  0x88   :  { %v68_v26 = vpop.permute.xlu0 %67   ;;  %v74_v27 = vpop.permute.xlu1 %73  }
  0x89   :  { %70 = vst.msk [vmem:[#allocation0] sm:$0x1] %vm69_vm11, %v68_v26  }
  0x8a   :  { %76 = vst.msk [vmem:[#allocation0] sm:$0x1] %vm75_vm12, %v74_v27  }
  0x8c   :  { %v80_v28 = vpop.permute.xlu0 %79   ;;  %v86_v29 = vpop.permute.xlu1 %85  }
  0x8d   :  { %82 = vst.msk [vmem:[#allocation0] sm:$0x1] %vm81_vm13, %v80_v28  }
  0x8e   :  { %88 = vst.msk [vmem:[#allocation0] sm:$0x1] %vm87_vm14, %v86_v29  }
  0x90   :  { %v92_v30 = vpop.permute.xlu0 %91  }
  0x91   :  { %94 = vst.msk [vmem:[#allocation0] sm:$0x1] %vm93_vm15, %v92_v30  }
  0x98   :  { %v98_v31 = vld [vmem:[#allocation0] sm:$0x1] }
  0x99   :  { %100 = vst [vmem:[%s208_s1] sm:$0x1] %v98_v31 }

// kernel: residual_block_pallas.1
= control target key start
LH: loop header
LB: loop body
LE: loop exit
PB: predicated region body
PF: predicated region fallthrough
CT: control target
= control target key end

     0   :  { %vm107_vm0 = vcmask 523264   ;;  %vm400_vm1 = vcmask 261120   ;;  %s1661_s5 = inlined_call_operand.vmem [shape: bf16[3,64,128], index: 5, kind: input, shape index: {}]   ;;  %s1662_s1 = inlined_call_operand.vmem [shape: bf16[32,64], index: 1, kind: input, shape index: {}]   ;;  %s1663_s0 = inlined_call_operand.vmem [shape: bf16[32,64], index: 0, kind: input, shape index: {}]   ;;  %s1664_s2 = inlined_call_operand.vmem [shape: bf16[32,64], index: 2, kind: input, shape index: {}]   ;;  %s1665_s6 = inlined_call_operand.vmem [shape: bf16[3,128,128], index: 6, kind: input, shape index: {}]   ;;  %s1666_s3 = inlined_call_operand.vmem [shape: bf16[32,32], index: 3, kind: input, shape index: {}]   ;;  %s1667_s4 = inlined_call_operand.vmem [shape: bf16[32,32], index: 4, kind: input, shape index: {}]   ;;  %s1668_s8 = inlined_call_operand.vmem [shape: f32[1,128], index: 8, kind: input, shape index: {}]   ;;  %s1669_s9 = inlined_call_operand.vmem [shape: f32[1,128], index: 9, kind: input, shape index: {}]   ;;  %s1670_s7 = inlined_call_operand.vmem [shape: bf16[64,128], index: 7, kind: input, shape index: {}]   ;;  %s1671_s12 = inlined_call_operand.vmem [shape: f32[1,128], index: 12, kind: input, shape index: {}]   ;;  %s1672_s13 = inlined_call_operand.vmem [shape: f32[1,128], index: 13, kind: input, shape index: {}]   ;;  %s1673_s10 = inlined_call_operand.vmem [shape: f32[1,128], index: 10, kind: input, shape index: {}]   ;;  %s1674_s11 = inlined_call_operand.vmem [shape: f32[1,128], index: 11, kind: input, shape index: {}]   ;;  %s1675_s14 = inlined_call_operand.vmem [shape: f32[32,128], index: 14, kind: output, shape index: {}]  }
   0x1   :  { %v1333_v0 = vld [vmem:[%s1661_s5 + $0x20] sm:$0xff]   ;;  %v1334_v1 = vld [vmem:[%s1661_s5 + $0x28] sm:$0xff]   ;;  %v1335_v2 = vld [vmem:[%s1661_s5 + $0x30] sm:$0xff]  }
   0x2   :  { %1193 = vmatprep.subr.bf16.mxu0 %v1333_v0  ;;  %v1470_v3 = vld [vmem:[%s1662_s1] sm:$0xff]   ;;  %v1336_v4 = vld [vmem:[%s1661_s5 + $0x38] sm:$0xff]   ;;  %v1483_v6 = vld [vmem:[%s1662_s1 + $0x8] sm:$0xff]  }
   0x3   :  { %1194 = vmatpush3.bf16.msra.mxu0 %v1333_v0  ;;  %1201 = vmatprep.mubr.msk.bf16.mxu0 %vm107_vm0, %v1470_v3  ;;  %v1338_v5 = vld [vmem:[%s1661_s5] sm:$0xff]   ;;  %v1340_v8 = vld [vmem:[%s1661_s5 + $0x8] sm:$0xff]   ;;  %v1341_v9 = vld [vmem:[%s1661_s5 + $0x10] sm:$0xff]  }
   0x4   :  { %1195 = vmatprep.subr.bf16.mxu0 %v1334_v1  ;;  %v1343_v7 = vld [vmem:[%s1663_s0] sm:$0xff]   ;;  %v1342_v10 = vld [vmem:[%s1661_s5 + $0x18] sm:$0xff]   ;;  %v1345_v12 = vld [vmem:[%s1663_s0 + $0x8] sm:$0xff]  }
   0x5   :  { %v1344_v11 = vld [vmem:[%s1661_s5 + $0x40] sm:$0xff]   ;;  %v1346_v14 = vld [vmem:[%s1661_s5 + $0x48] sm:$0xff]   ;;  %v1347_v15 = vld [vmem:[%s1661_s5 + $0x50] sm:$0xff]  }
   0x6   :  { %v1349_v13 = vld [vmem:[%s1664_s2] sm:$0xff]   ;;  %v1348_v16 = vld [vmem:[%s1661_s5 + $0x58] sm:$0xff]   ;;  %v1350_v18 = vld [vmem:[%s1664_s2 + $0x8] sm:$0xff]  }
   0x7   :  { %1196 = vmatpush3.bf16.msra.mxu0 %v1334_v1  ;;  %v1351_v17 = vld [vmem:[%s1665_s6 + $0x40] sm:$0xff]   ;;  %v1352_v19 = vld [vmem:[%s1665_s6 + $0x48] sm:$0xff]   ;;  %v1353_v20 = vld [vmem:[%s1665_s6 + $0x50] sm:$0xff]  }
   0x8   :  { %1197 = vmatprep.subr.bf16.mxu0 %v1335_v2  ;;  %v1354_v21 = vld [vmem:[%s1665_s6 + $0x58] sm:$0xff]   ;;  %v1355_v22 = vld [vmem:[%s1665_s6 + $0x60] sm:$0xff]   ;;  %v1356_v23 = vld [vmem:[%s1665_s6 + $0x68] sm:$0xff]  }
   0x9   :  { %v1357_v24 = vld [vmem:[%s1665_s6 + $0x70] sm:$0xff]   ;;  %v1358_v25 = vld [vmem:[%s1665_s6 + $0x78] sm:$0xff]   ;;  %v1359_v26 = vld [vmem:[%s1666_s3] sm:$0xff]  }
   0xa   :  { %1233 = vmatprep.mubr.msk.bf16.mxu1 %vm400_vm1, %v1359_v26  ;;  %v1055_v27 = vld [vmem:[%s1668_s8] ss:$0 sm:$0xff]  ;;  %v1360_v47 = vld [vmem:[%s1666_s3 + $0x8] sm:$0xff]   ;;  %v1365_v52 = vld [vmem:[%s1665_s6 + $0x10] sm:$0xff]  }
   0xb   :  { %1198 = vmatpush3.bf16.msra.mxu0 %v1335_v2  ;;  %v1056_v29 = vld [vmem:[%s1669_s9] ss:$0 sm:$0xff]  ;;  %v1362_v50 = vld [vmem:[%s1667_s4 + $0x8] sm:$0xff]   ;;  %v1366_v53 = vld [vmem:[%s1665_s6 + $0x18] sm:$0xff]  }
   0xc   :  { %1199 = vmatprep.subr.bf16.mxu0 %v1336_v4  ;;  %v1361_v48 = vld [vmem:[%s1667_s4] sm:$0xff]   ;;  %v1364_v51 = vld [vmem:[%s1665_s6 + $0x8] sm:$0xff]   ;;  %v1369_v56 = vld [vmem:[%s1665_s6 + $0x30] sm:$0xff]  }
   0xd   :  { %v1363_v49 = vld [vmem:[%s1665_s6] sm:$0xff]   ;;  %v1368_v55 = vld [vmem:[%s1665_s6 + $0x28] sm:$0xff]   ;;  %v1370_v57 = vld [vmem:[%s1665_s6 + $0x38] sm:$0xff]  }
   0xe   :  { %v1367_v54 = vld [vmem:[%s1665_s6 + $0x20] sm:$0xff]   ;;  %v1377_v60 = vld [vmem:[%s1670_s7 + $0x8] sm:$0xff]   ;;  %v1379_v61 = vld [vmem:[%s1670_s7 + $0x10] sm:$0xff]  }
   0xf   :  { %1200 = vmatpush3.bf16.msra.mxu0 %v1336_v4  ;;  %v1371_v58 = vld [vmem:[%s1665_s6 + $0x80] sm:$0xff]   ;;  %v1381_v62 = vld [vmem:[%s1670_s7 + $0x18] sm:$0xff]  }
  0x10   :  { %1205 = vmatprep.subr.bf16.mxu0 %v1338_v5  ;;  %v1375_v59 = vld [vmem:[%s1670_s7] sm:$0xff]  }
  0x11   :  { %v1129_v26 = vld [vmem:[%s1671_s12] ss:$0 sm:$0xff] }
  0x12   :  { %1202 = vmatmul.mubr.msk.bf16.vlgmr.msra.gmra.mrb[0].mxu0 %vm107_vm0, %v1483_v6 }
  0x13   :  { %1206 = vmatpush3.bf16.msra.mxu0 %v1338_v5  ;;  %1213 = vmatprep.mubr.msk.bf16.mxu0 %vm107_vm0, %v1343_v7 }
  0x14   :  { %1207 = vmatprep.subr.bf16.mxu0 %v1340_v8 }
  0x17   :  { %1208 = vmatpush3.bf16.msra.mxu0 %v1340_v8 }
  0x18   :  { %1209 = vmatprep.subr.bf16.mxu0 %v1341_v9 }
  0x1b   :  { %1210 = vmatpush3.bf16.msra.mxu0 %v1341_v9 }
  0x1c   :  { %1211 = vmatprep.subr.bf16.mxu0 %v1342_v10 }
  0x1f   :  { %1212 = vmatpush3.bf16.msra.mxu0 %v1342_v10  ;;  %v1372_v10 = vld [vmem:[%s1665_s6 + $0x88] sm:$0xff]  }
  0x20   :  { %1217 = vmatprep.subr.bf16.mxu0 %v1344_v11 }
  0x22   :  { %1214 = vmatmul.mubr.msk.bf16.vlgmr.msra.gmra.mrb[0].mxu0 %vm107_vm0, %v1345_v12 }
  0x23   :  { %1218 = vmatpush3.bf16.msra.mxu0 %v1344_v11  ;;  %1225 = vmatprep.mubr.msk.bf16.mxu0 %vm107_vm0, %v1349_v13 }
  0x24   :  { %1219 = vmatprep.subr.bf16.mxu0 %v1346_v14 }
  0x27   :  { %1220 = vmatpush3.bf16.msra.mxu0 %v1346_v14 }
  0x28   :  { %1221 = vmatprep.subr.bf16.mxu0 %v1347_v15 }
  0x2b   :  { %1222 = vmatpush3.bf16.msra.mxu0 %v1347_v15 }
  0x2c   :  { %1223 = vmatprep.subr.bf16.mxu0 %v1348_v16 }
  0x2f   :  { %1224 = vmatpush3.bf16.msra.mxu0 %v1348_v16 }
  0x30   :  { %1245 = vmatprep.subr.bf16.mxu0 %v1351_v17 }
  0x32   :  { %1226 = vmatmul.mubr.msk.bf16.vlgmr.msra.gmra.mrb[0].mxu0 %vm107_vm0, %v1350_v18  ;;  %v1376_v18 = vld [vmem:[%s1665_s6 + $0xa0] sm:$0xff]  }
  0x33   :  { %1246 = vmatpush3.bf16.msra.mxu0 %v1351_v17  ;;  %v1374_v17 = vld [vmem:[%s1665_s6 + $0x98] sm:$0xff]  }
  0x34   :  { %1247 = vmatprep.subr.bf16.mxu0 %v1352_v19 }
  0x37   :  { %1248 = vmatpush3.bf16.msra.mxu0 %v1352_v19  ;;  %v1378_v19 = vld [vmem:[%s1665_s6 + $0xa8] sm:$0xff]  }
  0x38   :  { %1249 = vmatprep.subr.bf16.mxu0 %v1353_v20 }
  0x3b   :  { %1250 = vmatpush3.bf16.msra.mxu0 %v1353_v20  ;;  %v1380_v20 = vld [vmem:[%s1665_s6 + $0xb0] sm:$0xff]  }
  0x3c   :  { %1251 = vmatprep.subr.bf16.mxu0 %v1354_v21 }
  0x3f   :  { %1252 = vmatpush3.bf16.msra.mxu0 %v1354_v21  ;;  %v1382_v21 = vld [vmem:[%s1665_s6 + $0xb8] sm:$0xff]  }
  0x40   :  { %1253 = vmatprep.subr.bf16.mxu0 %v1355_v22 }
  0x43   :  { %1254 = vmatpush3.bf16.msra.mxu0 %v1355_v22 }
  0x44   :  { %1255 = vmatprep.subr.bf16.mxu0 %v1356_v23 }
  0x47   :  { %1256 = vmatpush3.bf16.msra.mxu0 %v1356_v23 }
  0x48   :  { %1257 = vmatprep.subr.bf16.mxu0 %v1357_v24 }
  0x4b   :  { %1258 = vmatpush3.bf16.msra.mxu0 %v1357_v24 }
  0x4c   :  { %1259 = vmatprep.subr.bf16.mxu0 %v1358_v25 }
  0x4f   :  { %1260 = vmatpush3.bf16.msra.mxu0 %v1358_v25 }
  0x50   :  { %1305 = vmatprep.subr.bf16.mxu0 %v1375_v59 }
 0x105   :  { %v1227_v28 = vpop.f32.mrb[0].mxu0 }
 0x106   :  { %v367_v30 = vmul.f32 %v1227_v28, %v1055_v27  ;;  %v339_v31 = vpop.f32.mrb[1].mxu0  ;;  %v1130_v28 = vld [vmem:[%s1672_s13] ss:$0 sm:$0xff] }
 0x107   :  { %v365_v32 = vmul.f32 %v1055_v27, %v339_v31  ;;  %v1228_v33 = vpop.f32.mrb[2].mxu0 }
 0x108   :  { %v378_v34 = vadd.f32 %v1056_v29, %v367_v30  ;;  %v368_v35 = vmul.f32 %v1228_v33, %v1055_v27  ;;  %v342_v36 = vpop.f32.mrb[3].mxu0  ;;  %v1121_v30 = vld [vmem:[%s1673_s10] ss:$0 sm:$0xff] }
 0x109   :  { %v376_v37 = vadd.f32 %v1056_v29, %v365_v32  ;;  %v366_v38 = vmul.f32 %v1055_v27, %v342_v36 }
 0x10a   :  { %v379_v39 = vadd.f32 %v1056_v29, %v368_v35  ;;  %v382_v41 = vmax.f32 %v378_v34, 0.0  ;;  %v1122_v34 = vld [vmem:[%s1674_s11] ss:$0 sm:$0xff] }
 0x10b   :  { %v377_v40 = vadd.f32 %v1056_v29, %v366_v38  ;;  %v380_v43 = vmax.f32 %v376_v37, 0.0 }
 0x10c   :  { %v383_v42 = vmax.f32 %v379_v39, 0.0 }
 0x10d   :  { %v381_v44 = vmax.f32 %v377_v40, 0.0 }
 0x10e   :  { %v385_v45 = vpack.c.bf16 %v383_v42, %v382_v41 }
 0x10f   :  { %v384_v46 = vpack.c.bf16 %v381_v44, %v380_v43 }
 0x111   :  { %1229 = vmatprep.subr.bf16.mxu1 %v384_v46  ;;  %1261 = vmatprep.mubr.bf16.mxu0 %v384_v46 }
 0x112   :  { %1230 = vmatpush3.bf16.msra.mxu1 %v384_v46  ;;  %1262 = vmatmul.mubr.bf16.vlgmr.msra.gmra.mrb[4].mxu0 %v385_v45 }
 0x113   :  { %1231 = vmatprep.subr.bf16.mxu1 %v385_v45  ;;  %1313 = vmatprep.mubr.msk.bf16.mxu0 %vm107_vm0, %v1470_v3 }
 0x114   :  { %1306 = vmatpush3.bf16.msra.mxu0 %v1375_v59 }
 0x115   :  { %1307 = vmatprep.subr.bf16.mxu0 %v1377_v60 }
 0x116   :  { %1232 = vmatpush3.bf16.msra.mxu1 %v385_v45 }
 0x117   :  { %1237 = vmatprep.subr.bf16.mxu1 %v384_v46 }
 0x118   :  { %1308 = vmatpush3.bf16.msra.mxu0 %v1377_v60 }
 0x119   :  { %1234 = vmatmul.mubr.msk.bf16.vlgmr.msra.gmra.mrb[0].mxu1 %vm400_vm1, %v1360_v47  ;;  %1309 = vmatprep.subr.bf16.mxu0 %v1379_v61 }
 0x11a   :  { %1238 = vmatpush3.bf16.msra.mxu1 %v384_v46  ;;  %1241 = vmatprep.mubr.msk.bf16.mxu1 %vm400_vm1, %v1361_v48 }
 0x11b   :  { %1239 = vmatprep.subr.bf16.mxu1 %v385_v45 }
 0x11c   :  { %1310 = vmatpush3.bf16.msra.mxu0 %v1379_v61 }
 0x11d   :  { %1311 = vmatprep.subr.bf16.mxu0 %v1381_v62 }
 0x11e   :  { %1240 = vmatpush3.bf16.msra.mxu1 %v385_v45 }
 0x11f   :  { %1265 = vmatprep.subr.bf16.mxu1 %v1363_v49 }
 0x120   :  { %1312 = vmatpush3.bf16.msra.mxu0 %v1381_v62 }
 0x121   :  { %1242 = vmatmul.mubr.msk.bf16.vlgmr.msra.gmra.mrb[4].mxu1 %vm400_vm1, %v1362_v50 }
 0x122   :  { %1266 = vmatpush3.bf16.msra.mxu1 %v1363_v49 }
 0x123   :  { %1267 = vmatprep.subr.bf16.mxu1 %v1364_v51  ;;  %1314 = vmatmul.mubr.msk.bf16.vlgmr.msra.gmra.mrb[8].mxu0 %vm107_vm0, %v1483_v6  ;;  %v1373_v6 = vld [vmem:[%s1665_s6 + $0x90] sm:$0xff]  }
 0x126   :  { %1268 = vmatpush3.bf16.msra.mxu1 %v1364_v51 }
 0x127   :  { %1269 = vmatprep.subr.bf16.mxu1 %v1365_v52 }
 0x12a   :  { %1270 = vmatpush3.bf16.msra.mxu1 %v1365_v52 }
 0x12b   :  { %1271 = vmatprep.subr.bf16.mxu1 %v1366_v53 }
 0x12e   :  { %1272 = vmatpush3.bf16.msra.mxu1 %v1366_v53 }
 0x12f   :  { %1273 = vmatprep.subr.bf16.mxu1 %v1367_v54 }
 0x132   :  { %1274 = vmatpush3.bf16.msra.mxu1 %v1367_v54 }
 0x133   :  { %1275 = vmatprep.subr.bf16.mxu1 %v1368_v55 }
 0x136   :  { %1276 = vmatpush3.bf16.msra.mxu1 %v1368_v55 }
 0x137   :  { %1277 = vmatprep.subr.bf16.mxu1 %v1369_v56 }
 0x13a   :  { %1278 = vmatpush3.bf16.msra.mxu1 %v1369_v56 }
 0x13b   :  { %1279 = vmatprep.subr.bf16.mxu1 %v1370_v57 }
 0x13e   :  { %1280 = vmatpush3.bf16.msra.mxu1 %v1370_v57 }
 0x13f   :  { %1285 = vmatprep.subr.bf16.mxu1 %v1371_v58 }
 0x1e5   :  { %v1263_v63 = vpop.f32.mrb[4].mxu0 }
 0x1e6   :  { %v644_v0 = vpop.f32.mrb[5].mxu0 }
 0x1e7   :  { %v1264_v1 = vpop.f32.mrb[6].mxu0 }
 0x1e8   :  { %v1613_v2 = vpop.f32.mrb[7].mxu0 }
 0x1ec   :  { %v1235_v3 = vpop.f32.mrb[0].mxu1 }
 0x1ed   :  { %v441_v4 = vpop.f32.mrb[1].mxu1 }
 0x1ee   :  { %v1236_v5 = vpop.f32.mrb[2].mxu1 }
 0x1ef   :  { %v457_v7 = vpack.c.bf16 %v1236_v5, %v1235_v3  ;;  %v444_v8 = vpop.f32.mrb[3].mxu1 }
 0x1f0   :  { %v456_v9 = vpack.c.bf16 %v444_v8, %v441_v4 }
 0x1f2   :  { %1281 = vmatprep.mubr.bf16.mxu1 %v456_v9 }
 0x1f3   :  { %1282 = vmatmul.mubr.bf16.vlgmr.msra.gmra.mrb[8].mxu1 %v457_v7 }
 0x1f4   :  { %1286 = vmatpush3.bf16.msra.mxu1 %v1371_v58  ;;  %v1243_v11 = vpop.f32.mrb[4].mxu1 }
 0x1f5   :  { %1287 = vmatprep.subr.bf16.mxu1 %v1372_v10  ;;  %v512_v12 = vpop.f32.mrb[5].mxu1 }
 0x1f6   :  { %v1244_v13 = vpop.f32.mrb[6].mxu1  ;;  %v1315_v22 = vpop.f32.mrb[8].mxu0 }
 0x1f7   :  { %v528_v14 = vpack.c.bf16 %v1244_v13, %v1243_v11  ;;  %v515_v15 = vpop.f32.mrb[7].mxu1  ;;  %v962_v23 = vpop.f32.mrb[9].mxu0  ;;  %v986_v27 = vmul.f32 %v1315_v22, %v1129_v26 }
 0x1f8   :  { %1288 = vmatpush3.bf16.msra.mxu1 %v1372_v10  ;;  %v527_v16 = vpack.c.bf16 %v515_v15, %v512_v12  ;;  %v1316_v24 = vpop.f32.mrb[10].mxu0  ;;  %v984_v31 = vmul.f32 %v1129_v26, %v962_v23 }
 0x1f9   :  { %1289 = vmatprep.subr.bf16.mxu1 %v1373_v6  ;;  %v965_v25 = vpop.f32.mrb[11].mxu0  ;;  %v997_v37 = vadd.f32 %v1130_v28, %v986_v27  ;;  %v987_v39 = vmul.f32 %v1316_v24, %v1129_v26 }
 0x1fa   :  { %1301 = vmatprep.mubr.bf16.mxu1 %v527_v16  ;;  %v995_v42 = vadd.f32 %v1130_v28, %v984_v31  ;;  %v985_v44 = vmul.f32 %v1129_v26, %v965_v25 }
 0x1fb   :  { %v998_v51 = vadd.f32 %v1130_v28, %v987_v39 }
 0x1fc   :  { %1290 = vmatpush3.bf16.msra.mxu1 %v1373_v6  ;;  %v996_v54 = vadd.f32 %v1130_v28, %v985_v44 }
 0x1fd   :  { %1291 = vmatprep.subr.bf16.mxu1 %v1374_v17 }
 0x200   :  { %1292 = vmatpush3.bf16.msra.mxu1 %v1374_v17 }
 0x201   :  { %1293 = vmatprep.subr.bf16.mxu1 %v1376_v18 }
 0x204   :  { %1294 = vmatpush3.bf16.msra.mxu1 %v1376_v18 }
 0x205   :  { %1295 = vmatprep.subr.bf16.mxu1 %v1378_v19 }
 0x208   :  { %1296 = vmatpush3.bf16.msra.mxu1 %v1378_v19 }
 0x209   :  { %1297 = vmatprep.subr.bf16.mxu1 %v1380_v20 }
 0x20c   :  { %1298 = vmatpush3.bf16.msra.mxu1 %v1380_v20 }
 0x20d   :  { %1299 = vmatprep.subr.bf16.mxu1 %v1382_v21 }
 0x210   :  { %1300 = vmatpush3.bf16.msra.mxu1 %v1382_v21 }
 0x213   :  { %1302 = vmatmul.mubr.bf16.vlgmr.msra.gmra.mrb[8].mxu1 %v528_v14 }
 0x2e6   :  { %v1303_v29 = vpop.f32.mrb[8].mxu1 }
 0x2e7   :  { %v1317_v32 = vadd.f32 %v1303_v29, %v1263_v63  ;;  %v855_v33 = vpop.f32.mrb[9].mxu1 }
 0x2e8   :  { %v1318_v35 = vadd.f32 %v855_v33, %v644_v0  ;;  %v1304_v36 = vpop.f32.mrb[10].mxu1 }
 0x2e9   :  { %v883_v38 = vmul.f32 %v1317_v32, %v1121_v30  ;;  %v1319_v40 = vadd.f32 %v1304_v36, %v1264_v1  ;;  %v858_v41 = vpop.f32.mrb[11].mxu1 }
 0x2ea   :  { %v881_v43 = vmul.f32 %v1318_v35, %v1121_v30  ;;  %v1320_v45 = vadd.f32 %v858_v41, %v1613_v2 }
 0x2eb   :  { %v894_v46 = vadd.f32 %v1122_v34, %v883_v38  ;;  %v884_v47 = vmul.f32 %v1319_v40, %v1121_v30 }
 0x2ec   :  { %v892_v48 = vadd.f32 %v1122_v34, %v881_v43  ;;  %v882_v49 = vmul.f32 %v1320_v45, %v1121_v30 }
 0x2ed   :  { %v1001_v50 = vadd.f32 %v997_v37, %v894_v46  ;;  %v895_v52 = vadd.f32 %v1122_v34, %v884_v47 }
 0x2ee   :  { %v999_v53 = vadd.f32 %v995_v42, %v892_v48  ;;  %v893_v55 = vadd.f32 %v1122_v34, %v882_v49 }
 0x2ef   :  { %v1005_v56 = vmax.f32 %v1001_v50, 0.0  ;;  %v1002_v57 = vadd.f32 %v998_v51, %v895_v52 }
 0x2f0   :  { %v1003_v58 = vmax.f32 %v999_v53, 0.0  ;;  %v1000_v59 = vadd.f32 %v996_v54, %v893_v55 }
 0x2f1   :  { %1009 = vst [vmem:[%s1675_s14 + $0x10] sm:$0xff] %v1005_v56  ;;  %v1006_v60 = vmax.f32 %v1002_v57, 0.0 }
 0x2f2   :  { %1007 = vst [vmem:[%s1675_s14] sm:$0xff] %v1003_v58  ;;  %v1004_v61 = vmax.f32 %v1000_v59, 0.0 }
 0x2f3   :  { %1010 = vst [vmem:[%s1675_s14 + $0x18] sm:$0xff] %v1006_v60 }
 0x2f4   :  { %1008 = vst [vmem:[%s1675_s14 + $0x8] sm:$0xff] %v1004_v61 }

</bundles_post_ra>
